<compile_context>
chip_gen: v5e
topology: v5e:2x2
jax: 0.10.0
libtpu: 0.0.40
codegen_flags: <defaults>
</compile_context>

<pallas_src>
import functools

import jax
import jax.numpy as jnp
from jax.experimental import pallas as pl
from jax.experimental.pallas import tpu as pltpu


def mha_kernel(x_ref, wqkv_ref, bqkv_ref, wo_ref, bo_ref,
               out_ref, attnw_ref, acc_ref,
               *, num_heads, head_dim, batch_block, seq_len):
    """One grid step = (one batch chunk, one head).

    The head axis is the inner 'arbitrary' (reduction) axis: the Linear(E, 1)
    output is accumulated per head into `acc_ref` and written on the last head.
    """
    h = pl.program_id(1)
    bb, S, Dh = batch_block, seq_len, head_dim
    E = num_heads * head_dim

    @pl.when(h == 0)
    def _init():
        acc_ref[...] = jnp.zeros_like(acc_ref)

    # ---- per-head QKV projection: bf16 MXU operands, f32 accumulation ----
    x = x_ref[...].reshape(bb * S, E).astype(jnp.bfloat16)
    w = wqkv_ref[0]          # (3, E, Dh) bf16 (packed per head in the wrapper)
    b = bqkv_ref[0]          # (3, Dh)    f32

    def proj(j):             # j is a static Python int (0=Q, 1=K, 2=V)
        y = jnp.dot(x, w[j], preferred_element_type=jnp.float32) + b[j:j + 1]
        return y.reshape(bb, S, Dh)                                   # f32

    q, k, v = proj(0), proj(1), proj(2)

    # ---- scores + softmax (softmax math in f32, exact normalization) ----
    scale = 1.0 / (float(Dh) ** 0.5)
    scores = jnp.einsum('bqd,bkd->bqk',
                        q.astype(jnp.bfloat16), k.astype(jnp.bfloat16),
                        preferred_element_type=jnp.float32) * scale   # (bb,S,S)
    m = jnp.max(scores, axis=-1, keepdims=True)
    e = jnp.exp(scores - m)
    l = jnp.sum(e, axis=-1, keepdims=True)
    weights = e / l          # exact: these weights are returned to the user

    # lane-dense per-(batch-chunk, head) store, pipelined across the grid
    attnw_ref[...] = weights.reshape(bb, 1, S, S).astype(attnw_ref.dtype)

    # ---- context + this head's contribution to Linear(E, 1) ----
    ctx = jnp.einsum('bqk,bkd->bqd',
                     weights.astype(jnp.bfloat16), v.astype(jnp.bfloat16),
                     preferred_element_type=jnp.float32)              # (bb,S,Dh)
    # VPU multiply + lane reduce instead of an N=1 MXU matmul
    acc_ref[...] += jnp.sum(ctx * wo_ref[0], axis=-1)                 # (bb,S)

    @pl.when(h == num_heads - 1)
    def _finalize():
        out = acc_ref[...] + bo_ref[...]                              # (bb,S)
        out_ref[...] = out.reshape(bb, 1, S).astype(out_ref.dtype)


def _vmem_bytes_per_step(bb, S, E, H):
    Dh = E // H
    x_blk = bb * S * E * 4           # f32 input block
    attnw_blk = bb * S * S * 4       # attention-weights block (one head, f32)
    out_blk = bb * S * 4
    w_blk = 3 * E * Dh * 2           # bf16 packed per-head weights
    qkv_tmp = 3 * bb * S * Dh * 4    # q/k/v f32 temporaries
    # 2x double-buffered pipeline blocks + ~3x S^2 softmax temporaries
    return 2 * (x_blk + attnw_blk + out_blk + w_blk) + 3 * attnw_blk + 2 * qkv_tmp


def _pick_batch_block(B, S, E, H, budget_bytes=24 * 2**20):
    """Largest batch chunk that fits the VMEM budget while keeping >= 2 batch
    grid steps (so the 'parallel' axis can be split across TensorCores)."""
    best = 1
    for bb in range(1, B + 1):
        if B % bb:
            continue
        if B >= 2 and B // bb < 2:
            continue
        if _vmem_bytes_per_step(bb, S, E, H) <= budget_bytes:
            best = bb
    return best


def multi_head_attention(x, params, num_heads, *, batch_block=None,
                         attn_weights_dtype=jnp.float32):
    """x: (B, S, E) float32. Returns (output (B,S,1), attention_weights (B,H,S,S))."""
    B, S, E = x.shape
    assert E % num_heads == 0
    H = num_heads
    Dh = E // H
    wq, bq, wk, bk, wv, bv, wo, bo = params

    # Pack per-head Q/K/V weights as (H, 3, E, Dh) bf16: bf16 MXU fast path and
    # halves weight DMA; no head slicing / relayout inside the kernel.
    def per_head_w(w):                       # (E, E) -> (H, E, Dh)
        return jnp.transpose(w.reshape(E, H, Dh), (1, 0, 2))

    def per_head_b(b):                       # (1, E) -> (H, Dh)
        return b.reshape(H, Dh)

    w_qkv = jnp.stack([per_head_w(wq), per_head_w(wk), per_head_w(wv)],
                      axis=1).astype(jnp.bfloat16)          # (H, 3, E, Dh)
    b_qkv = jnp.stack([per_head_b(bq), per_head_b(bk), per_head_b(bv)],
                      axis=1)                               # (H, 3, Dh) f32
    wo_rows = wo.reshape(H, 1, Dh)           # (E,1) -> per-head rows (VPU reduce)
    bo2 = bo.reshape(1, 1)

    bb = batch_block if batch_block is not None else _pick_batch_block(B, S, E, H)
    assert B % bb == 0, "batch must be divisible by batch_block"
    grid = (B // bb, H)

    est = _vmem_bytes_per_step(bb, S, E, H)
    vmem_limit = int(max(32 * 2**20, min(48 * 2**20, 2 * est)))

    kernel = functools.partial(mha_kernel, num_heads=H, head_dim=Dh,
                               batch_block=bb, seq_len=S)

    out_shapes = (
        jax.ShapeDtypeStruct((B, 1, S), jnp.float32),        # S on the lane axis
        jax.ShapeDtypeStruct((B, H, S, S), attn_weights_dtype),
    )

    grid_spec = pltpu.PrefetchScalarGridSpec(
        num_scalar_prefetch=0,
        grid=grid,
        in_specs=[
            pl.BlockSpec((bb, S, E), lambda i, h: (i, 0, 0)),          # x chunk
            pl.BlockSpec((1, 3, E, Dh), lambda i, h: (h, 0, 0, 0)),    # W_qkv[h]
            pl.BlockSpec((1, 3, Dh), lambda i, h: (h, 0, 0)),          # b_qkv[h]
            pl.BlockSpec((1, 1, Dh), lambda i, h: (h, 0, 0)),          # Wo row[h]
            pl.BlockSpec((1, 1), lambda i, h: (0, 0)),                 # bo
        ],
        out_specs=[
            pl.BlockSpec((bb, 1, S), lambda i, h: (i, 0, 0)),          # output
            pl.BlockSpec((bb, 1, S, S), lambda i, h: (i, h, 0, 0)),    # attn weights
        ],
        scratch_shapes=[pltpu.VMEM((bb, S), jnp.float32)],             # out accumulator
    )

    out, attn_w = pl.pallas_call(
        kernel,
        out_shape=out_shapes,
        grid_spec=grid_spec,
        compiler_params=pltpu.CompilerParams(
            dimension_semantics=("parallel", "arbitrary"),
            vmem_limit_bytes=vmem_limit),
    )(x, w_qkv, b_qkv, wo_rows, bo2)

    # (B, 1, S) -> (B, S, 1) is a pure reshape of the same row-major bytes.
    return out.reshape(B, S, 1), attn_w


def reference_mha(x, params, num_heads):
    """Pure-JAX reference mirroring the PyTorch forward (all f32)."""
    wq, bq, wk, bk, wv, bv, wo, bo = params
    B, S, E = x.shape
    Dh = E // num_heads
    q = x @ wq + bq[0]
    k = x @ wk + bk[0]
    v = x @ wv + bv[0]
    q = q.reshape(B, S, num_heads, Dh).transpose(0, 2, 1, 3)
    k = k.reshape(B, S, num_heads, Dh).transpose(0, 2, 1, 3)
    v = v.reshape(B, S, num_heads, Dh).transpose(0, 2, 1, 3)
    scores = jnp.einsum("bhqd,bhkd->bhqk", q, k) / jnp.sqrt(jnp.float32(Dh))
    weights = jax.nn.softmax(scores, axis=-1)
    ctx = jnp.einsum("bhqk,bhkd->bhqd", weights, v)
    ctx = ctx.transpose(0, 2, 1, 3).reshape(B, S, E)
    out = ctx @ wo + bo[0]
    return out, weights


if __name__ == "__main__":
    # Small, deterministic shapes consistent with the module's forward.
    B, S, E, H = 2, 8, 32, 4

    key = jax.random.PRNGKey(0)
    k_x, k_wq, k_bq, k_wk, k_bk, k_wv, k_bv, k_wo, k_bo = jax.random.split(key, 9)

    x = jax.random.normal(k_x, (B, S, E), dtype=jnp.float32)

    def init_w(k, shape):
        return jax.random.normal(k, shape, dtype=jnp.float32) * 0.05

    params = (
        init_w(k_wq, (E, E)), init_w(k_bq, (1, E)),
        init_w(k_wk, (E, E)), init_w(k_bk, (1, E)),
        init_w(k_wv, (E, E)), init_w(k_bv, (1, E)),
        init_w(k_wo, (E, 1)), init_w(k_bo, (1, 1)),
    )

    out, attn_w = multi_head_attention(x, params, H)
    out = jax.block_until_ready(out)
    attn_w = jax.block_until_ready(attn_w)

    ref_out, ref_w = reference_mha(x, params, H)
    assert out.shape == (B, S, 1)
    assert attn_w.shape == (B, H, S, S)
    # tolerances account for bf16 MXU operands (f32 accumulation / softmax)
    assert jnp.allclose(out, ref_out, atol=5e-3, rtol=5e-3)
    assert jnp.allclose(attn_w, ref_w, atol=2e-3, rtol=2e-3)

    print("KERNEL_OK")
</pallas_src>

<mosaic_0001>
module attributes {stable_mosaic.version = 11 : i64} {
  func.func @mha_kernel(%arg0: i32, %arg1: i32, %arg2: memref<1x8x32xf32, #tpu.memory_space<vmem>>, %arg3: memref<1x3x32x8xbf16, #tpu.memory_space<vmem>>, %arg4: memref<1x3x8xf32, #tpu.memory_space<vmem>>, %arg5: memref<1x1x8xf32, #tpu.memory_space<vmem>>, %arg6: memref<1x1xf32, #tpu.memory_space<vmem>>, %arg7: memref<1x1x8xf32, #tpu.memory_space<vmem>>, %arg8: memref<1x1x8x8xf32, #tpu.memory_space<vmem>>, %arg9: memref<1x8xf32, #tpu.memory_space<vmem>>) attributes {dimension_semantics = [#tpu.dimension_semantics<parallel>, #tpu.dimension_semantics<arbitrary>], iteration_bounds = array<i64: 2, 4>, scalar_prefetch = 0 : i64, scratch_operands = 1 : i64, tpu.core_type = #tpu.core_type<tc>, window_params = [{transform_indices = @transform_0, window_bounds = array<i64: 1, 8, 32>}, {transform_indices = @transform_1, window_bounds = array<i64: 1, 3, 32, 8>}, {transform_indices = @transform_2, window_bounds = array<i64: 1, 3, 8>}, {transform_indices = @transform_3, window_bounds = array<i64: 1, 1, 8>}, {pipeline_mode = #tpu.pipeline_mode<synchronous>, transform_indices = @transform_4, window_bounds = array<i64: 1, 1>}, {transform_indices = @transform_5, window_bounds = array<i64: 1, 1, 8>}, {transform_indices = @transform_6, window_bounds = array<i64: 1, 1, 8, 8>}]} {
    %c0_i32 = arith.constant 0 : i32
    %0 = arith.cmpi eq, %arg1, %c0_i32 : i32
    %1 = arith.extui %0 : i1 to i32
    %c0_i32_0 = arith.constant 0 : i32
    %2 = arith.cmpi ne, %1, %c0_i32_0 : i32
    scf.if %2 {
      %cst_30 = arith.constant 0.000000e+00 : f32
      %62 = vector.broadcast %cst_30 : f32 to vector<1x8xf32>
      %c0_31 = arith.constant 0 : index
      %c0_32 = arith.constant 0 : index
      %63 = vector.load %arg9[%c0_31, %c0_32] : memref<1x8xf32, #tpu.memory_space<vmem>>, vector<1x8xf32>
      tpu.vector_store %arg9[%c0_31, %c0_32], %62 {strides = array<i32>} : memref<1x8xf32, #tpu.memory_space<vmem>>, vector<1x8xf32>,
    } else {
    }
    %c0 = arith.constant 0 : index
    %c0_1 = arith.constant 0 : index
    %c0_2 = arith.constant 0 : index
    %3 = vector.load %arg2[%c0, %c0_1, %c0_2] : memref<1x8x32xf32, #tpu.memory_space<vmem>>, vector<1x8x32xf32>
    %4 = vector.shape_cast %3 : vector<1x8x32xf32> to vector<8x32xf32>
    %5 = arith.truncf %4 : vector<8x32xf32> to vector<8x32xbf16>
    %c0_3 = arith.constant 0 : index
    %c0_4 = arith.constant 0 : index
    %c0_5 = arith.constant 0 : index
    %c0_6 = arith.constant 0 : index
    %6 = vector.load %arg3[%c0_3, %c0_4, %c0_5, %c0_6] : memref<1x3x32x8xbf16, #tpu.memory_space<vmem>>, vector<1x3x32x8xbf16>
    %7 = vector.shape_cast %6 : vector<1x3x32x8xbf16> to vector<3x32x8xbf16>
    %c0_7 = arith.constant 0 : index
    %c0_8 = arith.constant 0 : index
    %c0_9 = arith.constant 0 : index
    %8 = vector.load %arg4[%c0_7, %c0_8, %c0_9] : memref<1x3x8xf32, #tpu.memory_space<vmem>>, vector<1x3x8xf32>
    %9 = vector.shape_cast %8 : vector<1x3x8xf32> to vector<3x8xf32>
    %10 = vector.extract_strided_slice %7 {offsets = [0, 0, 0], sizes = [1, 32, 8], strides = [1, 1, 1]} : vector<3x32x8xbf16> to vector<1x32x8xbf16>
    %11 = vector.shape_cast %10 : vector<1x32x8xbf16> to vector<32x8xbf16>
    %cst = arith.constant dense<0.000000e+00> : vector<8x8xf32>
    %12 = tpu.matmul %5, %11, %cst {dimension_numbers = #tpu.dot_dimension_numbers<[1], [0], [0], [1], [0, 0, 1, 1], [], []>} : vector<8x32xbf16>, vector<32x8xbf16>, vector<8x8xf32> -> vector<8x8xf32>
    %13 = vector.extract_strided_slice %9 {offsets = [0, 0], sizes = [1, 8], strides = [1, 1]} : vector<3x8xf32> to vector<1x8xf32>
    %14 = vector.broadcast %13 : vector<1x8xf32> to vector<8x8xf32>
    %15 = arith.addf %12, %14 : vector<8x8xf32>
    %16 = vector.shape_cast %15 : vector<8x8xf32> to vector<1x8x8xf32>
    %17 = vector.extract_strided_slice %7 {offsets = [1, 0, 0], sizes = [1, 32, 8], strides = [1, 1, 1]} : vector<3x32x8xbf16> to vector<1x32x8xbf16>
    %18 = vector.shape_cast %17 : vector<1x32x8xbf16> to vector<32x8xbf16>
    %cst_10 = arith.constant dense<0.000000e+00> : vector<8x8xf32>
    %19 = tpu.matmul %5, %18, %cst_10 {dimension_numbers = #tpu.dot_dimension_numbers<[1], [0], [0], [1], [0, 0, 1, 1], [], []>} : vector<8x32xbf16>, vector<32x8xbf16>, vector<8x8xf32> -> vector<8x8xf32>
    %20 = vector.extract_strided_slice %9 {offsets = [1, 0], sizes = [1, 8], strides = [1, 1]} : vector<3x8xf32> to vector<1x8xf32>
    %21 = vector.broadcast %20 : vector<1x8xf32> to vector<8x8xf32>
    %22 = arith.addf %19, %21 : vector<8x8xf32>
    %23 = vector.shape_cast %22 : vector<8x8xf32> to vector<1x8x8xf32>
    %24 = vector.extract_strided_slice %7 {offsets = [2, 0, 0], sizes = [1, 32, 8], strides = [1, 1, 1]} : vector<3x32x8xbf16> to vector<1x32x8xbf16>
    %25 = vector.shape_cast %24 : vector<1x32x8xbf16> to vector<32x8xbf16>
    %cst_11 = arith.constant dense<0.000000e+00> : vector<8x8xf32>
    %26 = tpu.matmul %5, %25, %cst_11 {dimension_numbers = #tpu.dot_dimension_numbers<[1], [0], [0], [1], [0, 0, 1, 1], [], []>} : vector<8x32xbf16>, vector<32x8xbf16>, vector<8x8xf32> -> vector<8x8xf32>
    %27 = vector.extract_strided_slice %9 {offsets = [2, 0], sizes = [1, 8], strides = [1, 1]} : vector<3x8xf32> to vector<1x8xf32>
    %28 = vector.broadcast %27 : vector<1x8xf32> to vector<8x8xf32>
    %29 = arith.addf %26, %28 : vector<8x8xf32>
    %30 = vector.shape_cast %29 : vector<8x8xf32> to vector<1x8x8xf32>
    %31 = arith.truncf %16 : vector<1x8x8xf32> to vector<1x8x8xbf16>
    %32 = arith.truncf %23 : vector<1x8x8xf32> to vector<1x8x8xbf16>
    "tpu.trace_start"() <{level = 10 : i32, message = "bqd,bkd->bqk"}> : () -> ()
    %cst_12 = arith.constant dense<0.000000e+00> : vector<1x8x8xf32>
    %33 = tpu.matmul %31, %32, %cst_12 {dimension_numbers = #tpu.dot_dimension_numbers<[2], [2], [1], [1], [0, 0, 0, 1, 1, 1], [0], [0]>} : vector<1x8x8xbf16>, vector<1x8x8xbf16>, vector<1x8x8xf32> -> vector<1x8x8xf32>
    "tpu.trace_stop"() : () -> ()
    %cst_13 = arith.constant 0.353553385 : f32
    %34 = vector.broadcast %cst_13 : f32 to vector<1x8x8xf32>
    %35 = arith.mulf %33, %34 : vector<1x8x8xf32>
    %cst_14 = arith.constant dense<0xFF800000> : vector<1x8xf32>
    %36 = vector.multi_reduction <maximumf>, %35, %cst_14 [2] : vector<1x8x8xf32> to vector<1x8xf32>
    %37 = vector.shape_cast %36 : vector<1x8xf32> to vector<1x8x1xf32>
    %38 = vector.broadcast %37 : vector<1x8x1xf32> to vector<1x8x8xf32>
    %39 = arith.subf %35, %38 : vector<1x8x8xf32>
    %40 = math.exp %39 : vector<1x8x8xf32>
    %cst_15 = arith.constant dense<0.000000e+00> : vector<1x8xf32>
    %41 = vector.multi_reduction <add>, %40, %cst_15 [2] : vector<1x8x8xf32> to vector<1x8xf32>
    %42 = vector.shape_cast %41 : vector<1x8xf32> to vector<1x8x1xf32>
    %43 = vector.broadcast %42 : vector<1x8x1xf32> to vector<1x8x8xf32>
    %44 = arith.divf %40, %43 : vector<1x8x8xf32>
    %45 = vector.shape_cast %44 : vector<1x8x8xf32> to vector<1x1x8x8xf32>
    %c0_16 = arith.constant 0 : index
    %c0_17 = arith.constant 0 : index
    %c0_18 = arith.constant 0 : index
    %c0_19 = arith.constant 0 : index
    %46 = vector.load %arg8[%c0_16, %c0_17, %c0_18, %c0_19] : memref<1x1x8x8xf32, #tpu.memory_space<vmem>>, vector<1x1x8x8xf32>
    tpu.vector_store %arg8[%c0_16, %c0_17, %c0_18, %c0_19], %45 {strides = array<i32>} : memref<1x1x8x8xf32, #tpu.memory_space<vmem>>, vector<1x1x8x8xf32>,
    %47 = arith.truncf %44 : vector<1x8x8xf32> to vector<1x8x8xbf16>
    %48 = arith.truncf %30 : vector<1x8x8xf32> to vector<1x8x8xbf16>
    "tpu.trace_start"() <{level = 10 : i32, message = "bqk,bkd->bqd"}> : () -> ()
    %cst_20 = arith.constant dense<0.000000e+00> : vector<1x8x8xf32>
    %49 = tpu.matmul %47, %48, %cst_20 {dimension_numbers = #tpu.dot_dimension_numbers<[2], [1], [1], [2], [0, 0, 0, 1, 1, 2], [0], [0]>} : vector<1x8x8xbf16>, vector<1x8x8xbf16>, vector<1x8x8xf32> -> vector<1x8x8xf32>
    "tpu.trace_stop"() : () -> ()
    %c0_21 = arith.constant 0 : index
    %c0_22 = arith.constant 0 : index
    %50 = vector.load %arg9[%c0_21, %c0_22] : memref<1x8xf32, #tpu.memory_space<vmem>>, vector<1x8xf32>
    %c0_23 = arith.constant 0 : index
    %c0_24 = arith.constant 0 : index
    %c0_25 = arith.constant 0 : index
    %51 = vector.load %arg5[%c0_23, %c0_24, %c0_25] : memref<1x1x8xf32, #tpu.memory_space<vmem>>, vector<1x1x8xf32>
    %52 = vector.shape_cast %51 : vector<1x1x8xf32> to vector<1x8xf32>
    %53 = vector.shape_cast %52 : vector<1x8xf32> to vector<1x1x8xf32>
    %54 = vector.broadcast %53 : vector<1x1x8xf32> to vector<1x8x8xf32>
    %55 = arith.mulf %49, %54 : vector<1x8x8xf32>
    %cst_26 = arith.constant dense<0.000000e+00> : vector<1x8xf32>
    %56 = vector.multi_reduction <add>, %55, %cst_26 [2] : vector<1x8x8xf32> to vector<1x8xf32>
    %57 = arith.addf %50, %56 : vector<1x8xf32>
    %c0_27 = arith.constant 0 : index
    %c0_28 = arith.constant 0 : index
    %58 = vector.load %arg9[%c0_27, %c0_28] : memref<1x8xf32, #tpu.memory_space<vmem>>, vector<1x8xf32>
    tpu.vector_store %arg9[%c0_27, %c0_28], %57 {strides = array<i32>} : memref<1x8xf32, #tpu.memory_space<vmem>>, vector<1x8xf32>,
    %c3_i32 = arith.constant 3 : i32
    %59 = arith.cmpi eq, %arg1, %c3_i32 : i32
    %60 = arith.extui %59 : i1 to i32
    %c0_i32_29 = arith.constant 0 : i32
    %61 = arith.cmpi ne, %60, %c0_i32_29 : i32
    scf.if %61 {
      %c0_30 = arith.constant 0 : index
      %c0_31 = arith.constant 0 : index
      %62 = vector.load %arg9[%c0_30, %c0_31] : memref<1x8xf32, #tpu.memory_space<vmem>>, vector<1x8xf32>
      %c0_32 = arith.constant 0 : index
      %c0_33 = arith.constant 0 : index
      %63 = vector.load %arg6[%c0_32, %c0_33] : memref<1x1xf32, #tpu.memory_space<vmem>>, vector<1x1xf32>
      %64 = vector.broadcast %63 : vector<1x1xf32> to vector<1x8xf32>
      %65 = arith.addf %62, %64 : vector<1x8xf32>
      %66 = vector.shape_cast %65 : vector<1x8xf32> to vector<1x1x8xf32>
      %c0_34 = arith.constant 0 : index
      %c0_35 = arith.constant 0 : index
      %c0_36 = arith.constant 0 : index
      %67 = vector.load %arg7[%c0_34, %c0_35, %c0_36] : memref<1x1x8xf32, #tpu.memory_space<vmem>>, vector<1x1x8xf32>
      tpu.vector_store %arg7[%c0_34, %c0_35, %c0_36], %66 {strides = array<i32>} : memref<1x1x8xf32, #tpu.memory_space<vmem>>, vector<1x1x8xf32>,
    } else {
    }
    return
  }
  func.func @transform_0(%arg0: i32, %arg1: i32) -> (i32, i32, i32) {
    %c0_i32 = arith.constant 0 : i32
    %c0_i32_0 = arith.constant 0 : i32
    %c0_i32_1 = arith.constant 0 : i32
    return %arg0, %c0_i32, %c0_i32_0 : i32, i32, i32
  }
  func.func @transform_1(%arg0: i32, %arg1: i32) -> (i32, i32, i32, i32) {
    %c0_i32 = arith.constant 0 : i32
    %c0_i32_0 = arith.constant 0 : i32
    %c0_i32_1 = arith.constant 0 : i32
    %c0_i32_2 = arith.constant 0 : i32
    return %arg1, %c0_i32, %c0_i32_0, %c0_i32_1 : i32, i32, i32, i32
  }
  func.func @transform_2(%arg0: i32, %arg1: i32) -> (i32, i32, i32) {
    %c0_i32 = arith.constant 0 : i32
    %c0_i32_0 = arith.constant 0 : i32
    %c0_i32_1 = arith.constant 0 : i32
    return %arg1, %c0_i32, %c0_i32_0 : i32, i32, i32
  }
  func.func @transform_3(%arg0: i32, %arg1: i32) -> (i32, i32, i32) {
    %c0_i32 = arith.constant 0 : i32
    %c0_i32_0 = arith.constant 0 : i32
    %c0_i32_1 = arith.constant 0 : i32
    return %arg1, %c0_i32, %c0_i32_0 : i32, i32, i32
  }
  func.func @transform_4(%arg0: i32, %arg1: i32) -> (i32, i32) {
    %c0_i32 = arith.constant 0 : i32
    %c0_i32_0 = arith.constant 0 : i32
    %c0_i32_1 = arith.constant 0 : i32
    return %c0_i32, %c0_i32_0 : i32, i32
  }
  func.func @transform_5(%arg0: i32, %arg1: i32) -> (i32, i32, i32) {
    %c0_i32 = arith.constant 0 : i32
    %c0_i32_0 = arith.constant 0 : i32
    %c0_i32_1 = arith.constant 0 : i32
    return %arg0, %c0_i32, %c0_i32_0 : i32, i32, i32
  }
  func.func @transform_6(%arg0: i32, %arg1: i32) -> (i32, i32, i32, i32) {
    %c0_i32 = arith.constant 0 : i32
    %c0_i32_0 = arith.constant 0 : i32
    %c0_i32_1 = arith.constant 0 : i32
    return %arg0, %arg1, %c0_i32, %c0_i32_0 : i32, i32, i32, i32
  }
}

</mosaic_0001>

<bundles_post_ra>
// kernel: tpu_custom_call.1
= control target key start
LH: loop header
LB: loop body
LE: loop exit
PB: predicated region body
PF: predicated region fallthrough
CT: control target
= control target key end

     0   :  { %s1334_s0 = inlined_call_operand.vmem [shape: f32[2,8,32], index: 0, kind: input, shape index: {}]   ;;  %s1335_s1 = inlined_call_operand.vmem [shape: bf16[4,3,32,8], index: 1, kind: input, shape index: {}]   ;;  %s1336_s2 = inlined_call_operand.vmem [shape: f32[4,3,8], index: 2, kind: input, shape index: {}]   ;;  %s1337_s3 = inlined_call_operand.vmem [shape: f32[4,1,8], index: 3, kind: input, shape index: {}]   ;;  %s1338_s4 = inlined_call_operand.<no memory space> [shape: f32[1,1], index: 4, kind: input, shape index: {}]   ;;  %s1339_s5 = inlined_call_operand.hbm [shape: f32[2,1,8], index: 5, kind: output, shape index: {0}]   ;;  %s1340_s6 = inlined_call_operand.hbm [shape: f32[2,4,8,8], index: 6, kind: output, shape index: {1}]  }
   0x1   :  { %v12_v0 = vstv %s1338_s4 }
   0x2   :  { %13 = vst [vmem:[#allocation3] sm:$0x1] %v12_v0 }
   0x3   :  { %14 = vsyncpa [#allocation5], 0 }
   0x4   :  { %16 = vsyncpa [#allocation5 + $0x1], 0 }
   0x5   :  { %17 = vsyncpa [#allocation7], 0 }
   0x6   :  { %19 = vsyncpa [#allocation7 + $0x1], 0  ;;  %s1080_s23 = smov 0   ;;  %s1082_s24 = smov 0  }
   0x7   :  { %s1084_s25 = smov 0   ;;  %s1086_s26 = smov 0  }
   0x8   :  { %s1088_s27 = smov 0   ;;  %s1090_s28 = smov 0  }
   0x9   :  { %s1092_s29 = smov 0   ;;  %s1094_s4 = smov 0  }
   0xa   :  { %s1096_s30 = smov 0   ;;  %s1098_s7 = smov 0  }
   0xb   :  { %s1100_s8 = smov 0  }
   0xc LB: > { %1354 = sst [smem:[#allocation10_spill]] %s997_s23  ;;  %s724_s9 = sadd.s32 4294967295, %s1037_s8   ;;  %s1037_s8 = sphi %s1100_s8, %s25_s8   ;;  %s1033_s7 = sphi %s1098_s7, %s1388_s7   ;;  %s1029_s30 = sphi %s1096_s30, %s1395_s30   ;;  %s1025_s4 = sphi %s1094_s4, %s1386_s4   ;;  %s1021_s29 = sphi %s1092_s29, %s1385_s29   ;;  %s1017_s28 = sphi %s1090_s28, %s1394_s28   ;;  %s1013_s27 = sphi %s1088_s27, %s1393_s27   ;;  %s1009_s26 = sphi %s1086_s26, %s1392_s26   ;;  %s1005_s25 = sphi %s1084_s25, %s1391_s25   ;;  %s1001_s24 = sphi %s1082_s24, %s1390_s24   ;;  %s997_s23 = sphi %s1080_s23, %s1389_s23  }
   0xd   : > { %1355 = sst [smem:[#allocation11_spill]] %s1005_s25  ;;  %s725_s10 = sadd.s32 4294967294, %s1037_s8  }
   0xe   : > { %1356 = sst [smem:[#allocation12_spill]] %s1009_s26  ;;  %s34_s11 = sadd.s32 1, %s1029_s30 }
   0xf   : > { %1357 = sst [smem:[#allocation13_spill]] %s1017_s28  ;;  %s37_s12 = sadd.s32 1, %s1033_s7 }
  0x10   : > { %1358 = sst [smem:[#allocation14_spill]] %s1029_s30  ;;  %p35_p0 = scmp.ge.s32.totalorder %s34_s11, 4 }
  0x11   : > { %1359 = sst [smem:[#allocation15_spill]] %s1033_s7  ;;  %s169_s13 = sadd.s32 1, %s1017_s28 }
  0x12   : > { %1360 = sst [smem:[#allocation16_spill]] %s1037_s8  ;;  %p179_p1 = scmp.ne.s32.totalorder %s1017_s28, %s1013_s27 }
  0x13   : > { %p1142_p2 = scmp.eq.s32.totalorder %s724_s9, 7  ;;  %s1397_s11 = smov (%p35_p0, %s34_s11), 0 }
  0x14   : > { %1362 = sst [smem:[#allocation17_spill]] %s1397_s11  ;;  %s1399_s12 = smov (!%p35_p0, %s37_s12), %s1033_s7 }
  0x15   : > { %p1151_p3 = por %p1142_p2, %p179_p1  ;;  %p185_p4 = scmp.ne.s32.totalorder %s1013_s27, %s1009_s26 }
  0x16   : > { %p39_p5 = scmp.ge.s32.totalorder %s1399_s12, 2  ;;  %p1157_p6 = scmp.eq.s32.totalorder %s725_s10, 7 }
  0x17   : > { %s193_s17 = ssub.s32 %s1029_s30, %s1397_s11  ;;  %s197_s18 = sadd.s32 1, %s1005_s25 }
  0x18   : > { %s1401_s12 = smov (%p39_p5, %s1399_s12), 0  ;;  %p1168_p7 = por %p1157_p6, %p185_p4 }
  0x19   : > { %1365 = sst [smem:[#allocation18_spill]] %s1401_s12  ;;  %p207_p8 = scmp.ne.s32.totalorder %s1005_s25, %s1001_s24 }
  0x1a   : > { %s1366_s19 = scalar_select %p1168_p7, 1, 0 }
  0x1b   : > { %s166_s20 = ssub.s32 %s1033_s7, %s1401_s12  ;;  %p213_p9 = scmp.ne.s32.totalorder %s1001_s24, %s997_s23 }
  0x1c   : > { %1367 = sst [smem:[#allocation19_spill]] %s1366_s19  ;;  %p167_p10 = scmp.eq.s32.totalorder %s166_s20, 0 }
  0x1d   : > { %s194_s21 = sor.u32 %s193_s17, %s166_s20  ;;  %p1180_p12 = por %p207_p8, %p1142_p2 }
  0x1e   : > { %p195_p11 = scmp.eq.s32.totalorder %s194_s21, 0  ;;  %p1192_p13 = por %p213_p9, %p1157_p6 }
  0x1f   : > { %s1185_s9 = scalar_select %p167_p10, %s1017_s28, %s169_s13  }
  0x20   : > { %s1188_s10 = scalar_select %p195_p11, %s1005_s25, %s197_s18  }
  0x21   : > { %1369 = sst [smem:[#allocation20_spill]] %s1185_s9  ;;  %p728_p0 = scmp.ge.s32.totalorder %s1037_s8, 1 }
  0x22   : > { %1370 = sst [smem:[#allocation21_spill]] %s1188_s10  ;;  %p263_p1 = scmp.lt.s32.totalorder %s1037_s8, 9 }
  0x23   : > { %s1371_s11 = scalar_select %p1192_p13, 1, 0 }
  0x24   : > { %p264_p4 = pnand %p728_p0, %p263_p1 }
  0x25   : > { %1372 = sst [smem:[#allocation22_spill]] %s1371_s11  ;;  %s1346_s14 = sand.u32 (!%p264_p4), 1, %s1001_s24  }
  0x26   : > { %267 = sbr.rel (%p264_p4) target bundleno = 1137 (0x471), region = 40  ;;  %s1202_s16 = sshll.u32 (!%p264_p4), %s1346_s14, 3 }
  0x27   : > { %p308_p2 = scmp.lt.s32.totalorder (!%p264_p4), %s1025_s4, 1  ;;  %p312_p5 = scmp.lt.s32.totalorder (!%p264_p4), %s1021_s29, 3 }
  0x28   : > { %s307_s12 = scalar_lea.vmem (!%p264_p4), [#allocation6], %s1202_s16  ;;  %p733_p6 = scmp.ne.s32.totalorder (!%p264_p4), %s1021_s29, 0 }
  0x2b   : > { %s309_s17 = scalar_select %p308_p2, %s1025_s4, 1 }
  0x2c   : > { %s1208_s18 = scalar_select %p312_p5, %s1021_s29, 3 }
  0x2d   : > { %s730_s20 = sshll.u32 %s309_s17, 3  ;;  %s1373_s17 = sand.u32 1, %s1013_s27  }
  0x2e   : > { %s311_s7 = scalar_lea.vmem %s1334_s0, %s730_s20  ;;  %s775_s30 = smul.u32 48, %s1208_s18 }
  0x2f   : > { %s732_s13 = sshll.u32 %s1208_s18, 2  ;;  %s323_s14 = scalar_lea.vmem %s1337_s3, %s1208_s18 }
  0x30   : > { %s1222_s11 = scalar_lea.vmem %s1335_s1, %s775_s30  ;;  %s320_s26 = scalar_lea.vmem %s1336_s2, %s732_s13 }
  0x31   : > { %s1229_s8 = scalar_lea.vmem [#allocation4], %s1373_s17  ;;  %328 = sbr.rel (%p733_p6) target bundleno = 56 (0x38), region = 44 }
  0x36   : > { %vm329_vm0 = vcmask 57344   ;;  %v1039_v1 = vmov 0.0  }
  0x37   : > { %330 = vst.msk [vmem:[#allocation2] sm:$0x1] %vm329_vm0, %v1039_v1 }
  0x38 PF: > { %v770_v2 = vld [vmem:[%s1222_s11 + $0x8] sm:$0xff]  ;;  %v772_v3 = vld [vmem:[%s1222_s11 + $0x18] sm:$0xff]  ;;  %v769_v4 = vld [vmem:[%s1222_s11] sm:$0xff]  ;;  %vm359_vm1 = vcmask 261120   ;;  %vm430_vm2 = vcmask 64512   ;;  %vm481_vm3 = vcmask 1043456  }
  0x39   : > { %369 = vmatpush.bf16.msra.mxu0 %v770_v2  ;;  %395 = vmatpush.bf16.msra.mxu1 %v772_v3  ;;  %v771_v5 = vld [vmem:[%s1222_s11 + $0x10] sm:$0xff]  ;;  %v331_v6 = vld [vmem:[%s311_s7] sm:$0xff]  ;;  %v774_v20 = vld [vmem:[%s1222_s11 + $0x28] sm:$0xff]  ;;  %v1040_v55 = vmov 0   ;;  %v535_v2 = vlaneseq  ;;  %vm540_vm8 = vcmask 57344   ;;  %p763_p8 = scmp.ne.s32.totalorder %s1021_s29, 3 }
  0x3a   : > { %v332_v7 = vpack.c.bf16 %v331_v6, %v331_v6  ;;  %v345_v8 = vld [vmem:[%s320_s26] sm:$0x7]  ;;  %421 = vmatpush.bf16.msra.mxu2 %v774_v20  ;;  %879 = vset.pattern.permute.xlu1 %v1040_v55 }
  0x3b   : > { %v376_v9 = vperm.slane %v345_v8, 1  ;;  %v346_v12 = vperm.slane %v345_v8, 0  ;;  %v773_v21 = vld [vmem:[%s1222_s11 + $0x20] sm:$0xff]  ;;  %v402_v33 = vperm.slane %v345_v8, 2  ;;  %880 = vset.pattern.permute.xlu0 %v1040_v55  ;;  %v536_v3 = vand.u32 127, %v535_v2 }
  0x3c   : > { %v881_v50 = vld [vmem:[%s323_s14] ss:$0 sm:$0xff] }
  0x3d   : > { %370 = vmatpush.bf16.msra.mxu0 %v769_v4  ;;  %396 = vmatpush.bf16.msra.mxu1 %v771_v5 }
  0x3e   : > { %422 = vmatpush.bf16.msra.mxu2 %v773_v21  ;;  %v498_v4 = vld [vmem:[#allocation2] sm:$0x1] }
  0x40   : > { %742 = vmatmul.msk.bf16.vlgmr.msra.gmra.mxu0 %vm359_vm1, %v332_v7  ;;  %751 = vmatmul.msk.bf16.vlgmr.msra.gmra.mxu1 %vm359_vm1, %v332_v7 }
  0x41   : > { %760 = vmatmul.msk.bf16.vlgmr.msra.gmra.mxu2 %vm359_vm1, %v332_v7 }
  0xbd   : > { %v372_v10 = vpop.f32.mrf.mxu0  ;;  %v398_v11 = vpop.f32.mrf.mxu1 }
  0xbe   : > { %v399_v13 = vadd.f32 %v398_v11, %v376_v9  ;;  %v373_v15 = vadd.f32 %v372_v10, %v346_v12 }
  0xc0   : > { %v429_v14 = vpack.c.bf16 %v399_v13, %v399_v13  ;;  %v428_v19 = vpack.c.bf16 %v373_v15, %v373_v15 }
  0xc2   : > { %v435_v16 = vsel %vm430_vm2, %v429_v14, 0 }
  0xc3   : > { %444 = vmatpush.bf16.xpose.msra.mxu3 %v435_v16 }
  0xc4   : > { %v424_v26 = vpop.f32.mrf.mxu2 }
  0xc5   : > { %v374_v17 = vpop.f32.mrf.mxu0  ;;  %v400_v18 = vpop.f32.mrf.mxu1  ;;  %v425_v34 = vadd.f32 %v424_v26, %v402_v33 }
  0xc7   : > { %v477_v35 = vpack.c.bf16 %v425_v34, %v425_v34 }
  0xc9   : > { %v483_v36 = vsel %vm481_vm3, %v477_v35, 0 }
  0xca   : > { %761 = vmatmul.msk.bf16.vlgmr.msra.gmra.mxu3 %vm430_vm2, %v428_v19  ;;  %492 = vmatpush.bf16.msrb.mxu0 %v483_v36 }
  0xcc   : > { %v426_v30 = vpop.f32.mrf.mxu2 }
 0x14d   : > { %v446_v22 = vpop.f32.mrf.mxu3 }
 0x14e   : > { %v450_v23 = vmul.f32 0.35355338, %v446_v22 }
 0x150   : > { %v451_v24 = vsel %vm430_vm2, %v450_v23, -inf }
 0x151   : > { %452 = vmax.xlane.f32.xlu0 %v451_v24 }
 0x155   : > { %v448_v25 = vpop.f32.mrf.mxu3 }
 0x1c4   : > { %v453_v27 = vpop.xlane.xlu0 %452 }
 0x1c5   : > { %v454_v28 = vsub.f32 %v450_v23, %v453_v27 }
 0x1c7   : > { %v455_v29 = vmul.f32 1.442695, %v454_v28 }
 0x1c9   : > { %882 = vpow2.f32 %v455_v29 }
 0x1cf   : > { %v883_v31 = vpop.eup %882 }
 0x1d0   : > { %v457_v32 = vsel %vm430_vm2, %v883_v31, 0.0 }
 0x1d1   : > { %458 = vadd.xlane.f32.xlu0 %v457_v32 }
 0x244   : > { %v459_v37 = vpop.xlane.xlu0 %458 }
 0x245   : > { %884 = vrcp.f32 %v459_v37  ;;  %v471_v41 = vand.u32 2147483648, %v459_v37  ;;  %v469_v43 = vand.u32 2147483647, %v459_v37  ;;  %vm465_vm5 = vweird.f32 %v459_v37 }
 0x247   : > { %v472_v45 = vor.u32 1.1754944e-38, %v471_v41  ;;  %vm470_vm7 = vcmp.eq.f32.partialorder %v469_v43, 8.507059e+37 }
 0x24b   : > { %v885_v38 = vpop.eup %884 }
 0x24c   : > { %v461_v39 = vmul.f32 %v885_v38, %v459_v37  ;;  %vm466_vm4 = vweird.f32 %v885_v38 }
 0x24d   : > { %vm467_vm6 = vmor %vm465_vm5, %vm466_vm4 }
 0x24e   : > { %v462_v40 = vsub.f32 1.0, %v461_v39 }
 0x250   : > { %v463_v42 = vmul.f32 %v885_v38, %v462_v40 }
 0x252   : > { %v464_v44 = vadd.f32 %v885_v38, %v463_v42 }
 0x254   : > { %v468_v46 = vsel %vm467_vm6, %v885_v38, %v464_v44 }
 0x255   : > { %v473_v47 = vsel %vm470_vm7, %v472_v45, %v468_v46 }
 0x256   : > { %v474_v48 = vmul.f32 %v883_v31, %v473_v47 }
 0x258   : > { %475 = vst.msk [vmem:[%s307_s12] sm:$0xff] %vm430_vm2, %v474_v48  ;;  %v476_v49 = vpack.c.bf16 %v474_v48, %v474_v48 }
 0x25a   : > { %762 = vmatmul.msk.bf16.vlgmr.msrb.gmra.mxu0 %vm430_vm2, %v476_v49 }
 0x2d7   : > { %v494_v51 = vpop.f32.mrf.mxu0 }
 0x2d8   : > { %v503_v52 = vmul.f32 %v881_v50, %v494_v51 }
 0x2da   : > { %v504_v53 = vsel %vm430_vm2, %v503_v52, 0.0 }
 0x2db   : > { %505 = vadd.xlane.f32.xlu1 %v504_v53 }
 0x2df   : > { %v496_v54 = vpop.f32.mrf.mxu0 }
 0x34e   : > { %v506_v56 = vpop.xlane.xlu1 %505 }
 0x34f   : > { %v508_v57 = vperm.slane %v506_v56, 0  ;;  %v509_v58 = vperm.slane %v506_v56, 1  ;;  %v510_v59 = vperm.slane %v506_v56, 2  ;;  %v511_v60 = vperm.slane %v506_v56, 3 }
 0x350   : > { %v512_v61 = vperm.slane %v506_v56, 4  ;;  %v513_v62 = vperm.slane %v506_v56, 5  ;;  %v514_v63 = vperm.slane %v506_v56, 6  ;;  %v515_v0 = vperm.slane %v506_v56, 7 }
 0x351   : > { %516 = vst [vmem:[#allocation1] ss:$9 sm:$0xff] %v508_v57 }
 0x352   : > { %518 = vst [vmem:[#allocation1 + $0x1] ss:$9 sm:$0xff] %v509_v58 }
 0x353   : > { %520 = vst [vmem:[#allocation1 + $0x2] ss:$9 sm:$0xff] %v510_v59 }
 0x354   : > { %522 = vst [vmem:[#allocation1 + $0x3] ss:$9 sm:$0xff] %v511_v60 }
 0x355   : > { %524 = vst [vmem:[#allocation1 + $0x4] ss:$9 sm:$0xff] %v512_v61 }
 0x356   : > { %526 = vst [vmem:[#allocation1 + $0x5] ss:$9 sm:$0xff] %v513_v62 }
 0x357   : > { %528 = vst [vmem:[#allocation1 + $0x6] ss:$9 sm:$0xff] %v514_v63 }
 0x358   : > { %530 = vst [vmem:[#allocation1 + $0x7] ss:$9 sm:$0xff] %v515_v0 }
 0x35f   : > { %v531_v1 = vld [vmem:[#allocation1] sm:$0xff] }
 0x360   : > { %533 = vperm.xlu1 %879, %v531_v1  }
 0x3d2   : > { %v534_v5 = vpop.permute.xlu1 %533 }
 0x3d3   : > { %v537_v6 = vperm.slane %v534_v5, %v536_v3  ;;  %545 = sbr.rel (%p763_p8) target bundleno = 1106 (0x452), region = 48 }
 0x3d5   : > { %v539_v7 = vadd.f32 %v537_v6, %v498_v4 }
 0x3d7   : > { %541 = vst.msk [vmem:[#allocation2] sm:$0x1] %vm540_vm8, %v539_v7 }
 0x3d8   : > { %v547_v8 = vld [vmem:[#allocation3] sm:$0x1]  ;;  %v1041_v9 = vmov 0  }
 0x3d9   : > { %886 = vset.pattern.permute.xlu0 %v1041_v9 }
 0x3da   : > { %550 = vperm.xlu0 %886, %v547_v8  }
 0x3de   : > { %v546_v11 = vld [vmem:[#allocation2] sm:$0x1] }
 0x44c   : > { %v551_v10 = vpop.permute.xlu0 %550 }
 0x44d   : > { %v553_v12 = vperm.slane %v551_v10, 0 }
 0x44f   : > { %v554_v13 = vadd.f32 %v553_v12, %v546_v11 }
 0x451   : > { %555 = vst.msk [vmem:[%s1229_s8] sm:$0x1] %vm540_vm8, %v554_v13 }
 0x452 PF: > { %s570_s30 = scalar_lea.hbm %s1339_s5, %s1025_s4  ;;  %s572_s7 = sshll.u32 %s1229_s8, 4  ;;  %s573_s7 = int_to_ptr.vmem [resolvable:$true] %s572_s7 }
 0x453   : > { %s574_s11 = sshll.u32 %s570_s30, 4  ;;  %s1374_s19 = sand.u32 1, %s1013_s27   ;;  %s575_s11 = int_to_ptr.hbm [resolvable:$true] %s574_s11 }
 0x454   : > { %s557_s9 = scalar_lea.sflag [#allocation5], %s1374_s19  ;;  %s901_s10 = sshra.s32 %s575_s11, 4  ;;  %s902_s10 = int_to_ptr.hbm [resolvable:$true] %s901_s10 }
 0x455   : > { %s903_s13 = scalar_lea.hbm %s902_s10, 1  ;;  %s907_s20 = scalar_lea.hbm %s1339_s5, 2 }
 0x456   : > { %p904_p9 = scmp.ne.s32.totalorder %s902_s10, %s903_s13  ;;  %p908_p0 = scmp.lt.s32.totalorder %s902_s10, %s1339_s5 }
 0x457   : > { %p909_p1 = scmp.lt.s32.totalorder %s907_s20, %s903_s13 }
 0x458   : > { %p905_p10 = pnand %p904_p9, %p1151_p3 }
 0x459   : > { %p910_p4 = por %p909_p1, %p908_p0 }
 0x45a   : > { %p906_p11 = pneg %p905_p10 }
 0x45c   : > { %p911_p2 = pnand %p910_p4, %p906_p11 }
 0x45e   : > { %914 = shalt.err (!%p911_p2)
}
 0x45f   : > { %776 = dma.vmem_to_hbm [thread:$0]  (%p1151_p3), %s573_s7, 16, %s575_s11, %s557_s9  }
 0x460   : > { %s765_s8 = sshll.u32 %s1025_s4, 2  ;;  %s588_s25 = sshll.u32 %s307_s12, 4  ;;  %s589_s25 = int_to_ptr.vmem [resolvable:$true] %s588_s25 }
 0x461   : > { %s584_s23 = sadd.s32 %s1021_s29, %s765_s8  ;;  %s1375_s13 = sand.u32 1, %s1001_s24  }
 0x462   : > { %s766_s26 = sshll.u32 %s584_s23, 3  ;;  %s561_s15 = scalar_lea.sflag [#allocation7], %s1375_s13 }
 0x463   : > { %s586_s19 = scalar_lea.hbm %s1340_s6, %s766_s26  ;;  %s935_s16 = scalar_lea.hbm %s1340_s6, 64 }
 0x464   : > { %s590_s10 = sshll.u32 %s586_s19, 4  ;;  %s591_s10 = int_to_ptr.hbm [resolvable:$true] %s590_s10 }
 0x465   : > { %s929_s14 = sshra.s32 %s591_s10, 4  ;;  %s930_s14 = int_to_ptr.hbm [resolvable:$true] %s929_s14 }
 0x466   : > { %s931_s18 = scalar_lea.hbm %s930_s14, 8  ;;  %p936_p8 = scmp.lt.s32.totalorder %s930_s14, %s1340_s6 }
 0x467   : > { %p932_p5 = scmp.ne.s32.totalorder %s930_s14, %s931_s18  ;;  %p937_p9 = scmp.lt.s32.totalorder %s935_s16, %s931_s18 }
 0x469   : > { %p933_p3 = pnand %p932_p5, %p1180_p12  ;;  %p938_p10 = por %p937_p9, %p936_p8 }
 0x46b   : > { %p934_p6 = pneg %p933_p3 }
 0x46d   : > { %p939_p11 = pnand %p938_p10, %p934_p6 }
 0x46f   : > { %942 = shalt.err (!%p939_p11)
}
 0x470   : > { %777 = dma.vmem_to_hbm [thread:$0]  (%p1180_p12), %s589_s25, 128, %s591_s10, %s561_s15  }
 0x471 PF: > { %s1376_s11 = sld [smem:[#allocation16_spill]] }
 0x472   : > { %s1377_s9 = sld [smem:[#allocation12_spill]] }
 0x477   : > { %p787_p0 = scmp.ge.s32.totalorder %s1376_s11, 2 }
 0x478   : > { %s602_s21 = sand.u32 1, %s1377_s9  }
 0x479   : > { %p781_p1 = pnand %p787_p0, %p1168_p7  ;;  %s603_s17 = scalar_lea.sflag [#allocation5], %s602_s21 }
 0x47b   : > { %p782_p4 = pneg %p781_p1 }
 0x47d   : > { %988 = dma.done.wait (%p782_p4), %s603_s17, 16  }
 0x47e   : > { %990 = vsyncadd (%p782_p4), %s603_s17, 4294967280  ;;  %s1379_s8 = sld [smem:[#allocation10_spill]]  ;;  %p784_p2 = pnand %p787_p0, %p1192_p13 }
 0x480   : > { %p785_p5 = pneg %p784_p2 }
 0x484   : > { %s611_s26 = sand.u32 1, %s1379_s8  }
 0x485   : > { %s612_s22 = scalar_lea.sflag [#allocation7], %s611_s26 }
 0x486   : > { %992 = dma.done.wait (%p785_p5), %s612_s22, 128  }
 0x487   : > { %994 = vsyncadd (%p785_p5), %s612_s22, 4294967168  ;;  %s25_s8 = sadd.s32 1, %s1376_s11   ;;  %s1381_s25 = sld [smem:[#allocation11_spill]] }
 0x488   : > { %p22_p12 = scmp.ge.s32.totalorder %s25_s8, 10   ;;  %s1382_s28 = sld [smem:[#allocation21_spill]] }
 0x489   : > { %s1383_s30 = sld [smem:[#allocation13_spill]]  ;;  %s1389_s23 = smov %s1001_s24 }
 0x48a   : > { %s1384_s19 = sld [smem:[#allocation20_spill]]  ;;  %s1392_s26 = smov %s1013_s27 }
 0x48b   : > { %s1385_s29 = sld [smem:[#allocation14_spill]] }
 0x48c   : > { %s1386_s4 = sld [smem:[#allocation15_spill]] }
 0x48d   : > { %s1387_s10 = sld [smem:[#allocation17_spill]]  ;;  %s1390_s24 = smov %s1381_s25 }
 0x48e   : > { %s1388_s7 = sld [smem:[#allocation18_spill]]  ;;  %s1391_s25 = smov %s1382_s28 }
 0x48f   : > { %s1393_s27 = smov %s1383_s30  ;;  %24 = sbr.rel (!%p22_p12) target bundleno = 12 (0xc), region = 116 }
 0x490   : > { %s1394_s28 = smov %s1384_s19 }
 0x493   : > { %s1395_s30 = smov %s1387_s10 }
 0x494   :  { %618 = vsyncpa [#allocation5], 1 }
 0x495   :  { %620 = vsyncpa [#allocation5 + $0x1], 1 }
 0x496   :  { %621 = vsyncpa [#allocation7], 1 }
 0x497   :  { %623 = vsyncpa [#allocation7 + $0x1], 1 }

</bundles_post_ra>
